<compile_context>
chip_gen: v7x
topology: tpu7x:2x2x1
jax: 0.10.0
libtpu: 0.0.40
codegen_flags: <defaults>
</compile_context>

<pallas_src>
import functools

import jax
import jax.numpy as jnp
from jax.experimental import pallas as pl
from jax.experimental.pallas import tpu as pltpu


def _round_up(x, m):
    return (x + m - 1) // m * m


def _pcnn_kernel(emb_ref, bnd_ref, w_ref, b_ref, o_ref, im2col_sc, *,
                 window_size, padding, l_out):
    # emb_ref   : (TB, L, W)              f32 raw embeddings (conv zero padding handled here)
    # bnd_ref   : (TB, 1, 2)              int32 piece boundaries (b0, b1) per example
    # w_ref     : (win*W, H_pad)          bf16 fused conv weight, row index = r*W + w
    # b_ref     : (1, H_pad)              f32 conv bias
    # o_ref     : (TB, 1, 3*H_pad)        f32 relu(piecewise_max(conv) - 100), piece-major lanes
    # im2col_sc : (TB, L_out_pad, win*W)  bf16 scratch holding the im2col patches
    tb, seq_len, w_in = emb_ref.shape
    l_out_pad = im2col_sc.shape[1]
    k = w_ref.shape[0]
    h_pad = w_ref.shape[1]

    # ---- im2col: window_size shifted slices written side by side (zero padding in-kernel) ----
    emb_bf = emb_ref[...].astype(jnp.bfloat16)
    for r in range(window_size):                      # tiny static loop -> unrolled
        lo = max(0, padding - r)                      # first output row this tap can source
        hi = min(l_out, seq_len + padding - r)        # one past the last such row
        c0, c1 = r * w_in, (r + 1) * w_in
        if lo > 0:                                    # leading conv zero-padding rows
            im2col_sc[:, 0:lo, c0:c1] = jnp.zeros((tb, lo, w_in), jnp.bfloat16)
        if hi < l_out_pad:                            # trailing zero-padding + alignment rows
            im2col_sc[:, hi:l_out_pad, c0:c1] = jnp.zeros(
                (tb, l_out_pad - hi, w_in), jnp.bfloat16)
        if hi > lo:
            im2col_sc[:, lo:hi, c0:c1] = emb_bf[:, lo + r - padding:hi + r - padding, :]

    # ---- one fused MXU matmul: (TB*L_out_pad, win*W) @ (win*W, H_pad), f32 accumulation ----
    x = im2col_sc[...].reshape(tb * l_out_pad, k)     # free view: L_out_pad is a multiple of 8
    conv = jnp.dot(x, w_ref[...], preferred_element_type=jnp.float32)
    conv = conv.reshape(tb, l_out_pad, h_pad)         # (TB, L_out_pad, H_pad)

    # ---- piecewise max pooling (conv computed once; selector rebuilt from boundaries) ----
    # torch: relu(max_l(mask + conv_with_bias) - 100) with mask[b,l,p] = 100 * [l in piece p]
    #      = relu(max_l(where(sel_p, conv, conv - 100)) + bias)   (bias is constant over l)
    bnd = bnd_ref[...]                                # (TB, 1, 2) int32
    b0 = bnd[:, 0, 0].reshape(tb, 1, 1)
    b1 = bnd[:, 0, 1].reshape(tb, 1, 1)
    l_idx = jax.lax.broadcasted_iota(jnp.int32, (tb, l_out_pad, 1), 1)
    in_range = (l_idx < l_out) if l_out_pad != l_out else None
    base = conv - 100.0                               # out-of-piece contribution
    if in_range is not None:
        base = jnp.where(in_range, base, -1e30)       # seq-alignment rows never win the max
    sels = (l_idx <= b0,
            (l_idx > b0) & (l_idx <= b1),
            l_idx > b1)
    bias = b_ref[...]                                 # (1, H_pad)
    for p, sel in enumerate(sels):
        if in_range is not None:
            sel = sel & in_range
        pooled = jnp.max(jnp.where(sel, conv, base), axis=1)            # (TB, H_pad), XLU reduce
        o_ref[:, 0, p * h_pad:(p + 1) * h_pad] = jnp.maximum(pooled + bias, 0.0).astype(o_ref.dtype)


def pcnn_forward(embedding, piece_bounds, weight, bias, *, window_size, padding=1,
                 vmem_budget_bytes=24 * 1024 * 1024):
    """PCNN forward: relu(piecewise_max_pool(conv(embedding))).view(-1, 3*H).

    embedding   : (B, L, W) float32
    piece_bounds: (B, 2) int32  -- per-example piece boundaries (b0, b1). Equivalent to the torch
                  module's externally-set dense mask with mask[b,l,p] = 100 * [l in piece p],
                  piece0 = [0, b0], piece1 = (b0, b1], piece2 = (b1, L_out).
    weight      : (H, 1, window_size, W) float32 (torch Conv2d weight), bias: (H,) float32.
    """
    B, L, W = embedding.shape
    H = weight.shape[0]
    L_out = L + 2 * padding - window_size + 1
    L_out_pad = _round_up(L_out, 8)          # keeps reshapes / reductions (8,128)-tile aligned
    K = window_size * W
    H_pad = _round_up(H, 128)                # lane-dense MXU columns and unmasked stores
    assert piece_bounds.shape == (B, 2)

    # Fused conv weight: (H,1,win,W) -> (win*W, H_pad) with row index r*W + w; bf16 for the MXU.
    w_fused = jnp.transpose(weight[:, 0, :, :], (1, 2, 0)).reshape(K, H)
    w_fused = jnp.pad(w_fused, ((0, 0), (0, H_pad - H))).astype(jnp.bfloat16)
    b_pad = jnp.pad(bias.astype(jnp.float32), (0, H_pad - H)).reshape(1, H_pad)
    bnd3 = piece_bounds.astype(jnp.int32).reshape(B, 1, 2)
    embedding = embedding.astype(jnp.float32)   # HBM stays f32; bf16 cast happens in-kernel

    # --- padded-tile-aware VMEM budgeting (double-buffered blocks + in-kernel intermediates) ---
    def _var_bytes(tb):
        emb_blk = tb * _round_up(L, 8) * _round_up(W, 128) * 4          # f32 input block
        bnd_blk = tb * 8 * 128 * 4                                      # (1,2) tile pads to (8,128)
        out_blk = tb * 8 * 3 * H_pad * 4                                # single-row output slab
        im2col = tb * L_out_pad * _round_up(K, 128) * 2                 # bf16 scratch
        conv = tb * L_out_pad * H_pad * 4                               # f32 matmul output
        return 2 * (emb_blk + bnd_blk + out_blk) + im2col + 2 * conv    # 2x conv for select temps

    fixed = 2 * (_round_up(K, 8) * H_pad * 2 + 8 * H_pad * 4)           # resident weight + bias
    per_b = max(1, _var_bytes(8) // 8)
    TB = int(max(1, min(B, max(0, vmem_budget_bytes - fixed) // per_b)))
    if B > 1:
        TB = min(TB, -(-B // 2))             # >= 2 grid steps so v7x's 2 TensorCores both get work
    if TB >= 8:
        TB -= TB % 8                         # sublane-aligned batch tile
    grid = (pl.cdiv(B, TB),)
    vmem_limit = int(min(48 << 20, max(fixed + _var_bytes(TB) + (6 << 20), 20 << 20)))

    kernel = functools.partial(_pcnn_kernel, window_size=window_size, padding=padding,
                               l_out=L_out)

    out = pl.pallas_call(
        kernel,
        out_shape=jax.ShapeDtypeStruct((B, 1, 3 * H_pad), jnp.float32),
        grid=grid,
        in_specs=[
            pl.BlockSpec((TB, L, W), lambda i: (i, 0, 0)),        # embeddings (streamed)
            pl.BlockSpec((TB, 1, 2), lambda i: (i, 0, 0)),        # piece boundaries
            pl.BlockSpec((K, H_pad), lambda i: (0, 0)),           # fused conv weight (resident)
            pl.BlockSpec((1, H_pad), lambda i: (0, 0)),           # bias (resident)
        ],
        out_specs=pl.BlockSpec((TB, 1, 3 * H_pad), lambda i: (i, 0, 0)),
        scratch_shapes=[pltpu.VMEM((TB, L_out_pad, K), jnp.bfloat16)],
        compiler_params=pltpu.CompilerParams(
            dimension_semantics=("parallel",),   # shards the batch grid across TCs on v7x
            vmem_limit_bytes=vmem_limit,
        ),
    )(embedding, bnd3, w_fused, b_pad)

    # torch: x of shape (B, H, 3) -> .view(-1, 3*H) is H-major / piece-minor (layout plumbing).
    out = out.reshape(B, 3, H_pad)[:, :, :H]
    return jnp.transpose(out, (0, 2, 1)).reshape(B, 3 * H)


def pcnn_reference(embedding, piece_bounds, weight, bias, *, window_size, padding=1):
    """Plain-JAX reference with the exact torch PCNN semantics (dense 100/0 piecewise mask)."""
    B, L, W = embedding.shape
    H = weight.shape[0]
    L_out = L + 2 * padding - window_size + 1
    emb_pad = jnp.pad(embedding, ((0, 0), (padding, padding), (0, 0)))
    patches = jnp.stack([emb_pad[:, r:r + L_out, :] for r in range(window_size)], axis=2)
    conv = jnp.einsum('blrw,hrw->bhl', patches, weight[:, 0]) + bias[None, :, None]   # (B,H,L)
    l = jnp.arange(L_out)[None, :]
    b0 = piece_bounds[:, 0:1]
    b1 = piece_bounds[:, 1:2]
    sel = jnp.stack([l <= b0, (l > b0) & (l <= b1), l > b1], axis=-1)                 # (B,L,3)
    mask = sel.astype(jnp.float32) * 100.0
    x = mask[:, None, :, :] + conv[:, :, :, None]                                     # (B,H,L,3)
    pooled = jnp.max(x, axis=2) - 100.0                                               # (B,H,3)
    return jnp.maximum(pooled, 0.0).reshape(B, 3 * H)


if __name__ == "__main__":
    key = jax.random.PRNGKey(0)
    k_emb, k_w, k_b = jax.random.split(key, 3)

    # Small opt-consistent shapes: batch=3, hidden_size=32, sent_max_length=14,
    # word_dim=8, pos_dim=4 -> in_width=16, window_size=3, padding=(1,0).
    # (L_out=14 exercises the sequence-alignment path; B=3 exercises a partial last grid block.)
    B, hidden_size, sent_max_length = 3, 32, 14
    word_dim, pos_dim, window_size, padding = 8, 4, 3, 1
    in_width = word_dim + 2 * pos_dim

    embedding = jax.random.normal(k_emb, (B, sent_max_length, in_width), jnp.float32)
    weight = jax.random.normal(k_w, (hidden_size, 1, window_size, in_width), jnp.float32) * 0.1
    bias = jax.random.normal(k_b, (hidden_size,), jnp.float32) * 0.1

    # Per-example piece boundaries (the data pipeline normally derives the torch dense mask from
    # the two entity positions).  Third example has an empty middle piece (edge case).
    piece_bounds = jnp.array([[4, 9], [2, 11], [6, 6]], dtype=jnp.int32)

    out = pcnn_forward(embedding, piece_bounds, weight, bias,
                       window_size=window_size, padding=padding)
    out = jax.block_until_ready(out)

    ref = pcnn_reference(embedding, piece_bounds, weight, bias,
                         window_size=window_size, padding=padding)

    assert out.shape == (B, hidden_size * 3), out.shape
    err = float(jnp.max(jnp.abs(out - ref)))
    assert jnp.allclose(out, ref, atol=5e-2, rtol=5e-2), err

    print("KERNEL_OK")
</pallas_src>

<mosaic_0001>
module attributes {stable_mosaic.version = 11 : i64} {
  func.func @_pcnn_kernel(%arg0: i32, %arg1: memref<2x14x16xf32, #tpu.memory_space<vmem>>, %arg2: memref<2x1x2xi32, #tpu.memory_space<vmem>>, %arg3: memref<48x128xbf16, #tpu.memory_space<vmem>>, %arg4: memref<1x128xf32, #tpu.memory_space<vmem>>, %arg5: memref<2x1x384xf32, #tpu.memory_space<vmem>>, %arg6: memref<2x16x48xbf16, #tpu.memory_space<vmem>>) attributes {dimension_semantics = [#tpu.dimension_semantics<parallel>], iteration_bounds = array<i64: 2>, scalar_prefetch = 0 : i64, scratch_operands = 1 : i64, tpu.core_type = #tpu.core_type<tc>, window_params = [{transform_indices = @transform_0, window_bounds = array<i64: 2, 14, 16>}, {transform_indices = @transform_1, window_bounds = array<i64: 2, 1, 2>}, {pipeline_mode = #tpu.pipeline_mode<synchronous>, transform_indices = @transform_2, window_bounds = array<i64: 48, 128>}, {pipeline_mode = #tpu.pipeline_mode<synchronous>, transform_indices = @transform_3, window_bounds = array<i64: 1, 128>}, {transform_indices = @transform_4, window_bounds = array<i64: 2, 1, 384>}]} {
    %c0 = arith.constant 0 : index
    %c0_0 = arith.constant 0 : index
    %c0_1 = arith.constant 0 : index
    %0 = vector.load %arg1[%c0, %c0_0, %c0_1] : memref<2x14x16xf32, #tpu.memory_space<vmem>>, vector<2x14x16xf32>
    %1 = arith.truncf %0 : vector<2x14x16xf32> to vector<2x14x16xbf16>
    %cst = arith.constant 0.000000e+00 : bf16
    %2 = vector.broadcast %cst : bf16 to vector<2x1x16xbf16>
    %c0_2 = arith.constant 0 : index
    %c0_3 = arith.constant 0 : index
    %c0_4 = arith.constant 0 : index
    %3 = vector.load %arg6[%c0_2, %c0_3, %c0_4] : memref<2x16x48xbf16, #tpu.memory_space<vmem>>, vector<2x1x16xbf16>
    tpu.vector_store %arg6[%c0_2, %c0_3, %c0_4], %2 {strides = array<i32>} : memref<2x16x48xbf16, #tpu.memory_space<vmem>>, vector<2x1x16xbf16>,
    %cst_5 = arith.constant 0.000000e+00 : bf16
    %4 = vector.broadcast %cst_5 : bf16 to vector<2x2x16xbf16>
    %c0_6 = arith.constant 0 : index
    %c14 = arith.constant 14 : index
    %c0_7 = arith.constant 0 : index
    %5 = vector.load %arg6[%c0_6, %c14, %c0_7] : memref<2x16x48xbf16, #tpu.memory_space<vmem>>, vector<2x2x16xbf16>
    tpu.vector_store %arg6[%c0_6, %c14, %c0_7], %4 {strides = array<i32>} : memref<2x16x48xbf16, #tpu.memory_space<vmem>>, vector<2x2x16xbf16>,
    %6 = vector.extract_strided_slice %1 {offsets = [0, 0, 0], sizes = [2, 13, 16], strides = [1, 1, 1]} : vector<2x14x16xbf16> to vector<2x13x16xbf16>
    %c0_8 = arith.constant 0 : index
    %c1 = arith.constant 1 : index
    %c0_9 = arith.constant 0 : index
    %7 = vector.load %arg6[%c0_8, %c1, %c0_9] : memref<2x16x48xbf16, #tpu.memory_space<vmem>>, vector<2x13x16xbf16>
    tpu.vector_store %arg6[%c0_8, %c1, %c0_9], %6 {strides = array<i32>} : memref<2x16x48xbf16, #tpu.memory_space<vmem>>, vector<2x13x16xbf16>,
    %cst_10 = arith.constant 0.000000e+00 : bf16
    %8 = vector.broadcast %cst_10 : bf16 to vector<2x2x16xbf16>
    %c0_11 = arith.constant 0 : index
    %c14_12 = arith.constant 14 : index
    %c16 = arith.constant 16 : index
    %9 = vector.load %arg6[%c0_11, %c14_12, %c16] : memref<2x16x48xbf16, #tpu.memory_space<vmem>>, vector<2x2x16xbf16>
    tpu.vector_store %arg6[%c0_11, %c14_12, %c16], %8 {strides = array<i32>} : memref<2x16x48xbf16, #tpu.memory_space<vmem>>, vector<2x2x16xbf16>,
    %c0_13 = arith.constant 0 : index
    %c0_14 = arith.constant 0 : index
    %c16_15 = arith.constant 16 : index
    %10 = vector.load %arg6[%c0_13, %c0_14, %c16_15] : memref<2x16x48xbf16, #tpu.memory_space<vmem>>, vector<2x14x16xbf16>
    tpu.vector_store %arg6[%c0_13, %c0_14, %c16_15], %1 {strides = array<i32>} : memref<2x16x48xbf16, #tpu.memory_space<vmem>>, vector<2x14x16xbf16>,
    %cst_16 = arith.constant 0.000000e+00 : bf16
    %11 = vector.broadcast %cst_16 : bf16 to vector<2x3x16xbf16>
    %c0_17 = arith.constant 0 : index
    %c13 = arith.constant 13 : index
    %c32 = arith.constant 32 : index
    %12 = vector.load %arg6[%c0_17, %c13, %c32] : memref<2x16x48xbf16, #tpu.memory_space<vmem>>, vector<2x3x16xbf16>
    tpu.vector_store %arg6[%c0_17, %c13, %c32], %11 {strides = array<i32>} : memref<2x16x48xbf16, #tpu.memory_space<vmem>>, vector<2x3x16xbf16>,
    %13 = vector.extract_strided_slice %1 {offsets = [0, 1, 0], sizes = [2, 13, 16], strides = [1, 1, 1]} : vector<2x14x16xbf16> to vector<2x13x16xbf16>
    %c0_18 = arith.constant 0 : index
    %c0_19 = arith.constant 0 : index
    %c32_20 = arith.constant 32 : index
    %14 = vector.load %arg6[%c0_18, %c0_19, %c32_20] : memref<2x16x48xbf16, #tpu.memory_space<vmem>>, vector<2x13x16xbf16>
    tpu.vector_store %arg6[%c0_18, %c0_19, %c32_20], %13 {strides = array<i32>} : memref<2x16x48xbf16, #tpu.memory_space<vmem>>, vector<2x13x16xbf16>,
    %c0_21 = arith.constant 0 : index
    %c0_22 = arith.constant 0 : index
    %c0_23 = arith.constant 0 : index
    %15 = vector.load %arg6[%c0_21, %c0_22, %c0_23] : memref<2x16x48xbf16, #tpu.memory_space<vmem>>, vector<2x16x48xbf16>
    %16 = vector.shape_cast %15 : vector<2x16x48xbf16> to vector<32x48xbf16>
    %c0_24 = arith.constant 0 : index
    %c0_25 = arith.constant 0 : index
    %17 = vector.load %arg3[%c0_24, %c0_25] : memref<48x128xbf16, #tpu.memory_space<vmem>>, vector<48x128xbf16>
    %cst_26 = arith.constant dense<0.000000e+00> : vector<32x128xf32>
    %18 = tpu.matmul %16, %17, %cst_26 {dimension_numbers = #tpu.dot_dimension_numbers<[1], [0], [0], [1], [0, 0, 1, 1], [], []>} : vector<32x48xbf16>, vector<48x128xbf16>, vector<32x128xf32> -> vector<32x128xf32>
    %19 = vector.shape_cast %18 : vector<32x128xf32> to vector<2x16x128xf32>
    %c0_27 = arith.constant 0 : index
    %c0_28 = arith.constant 0 : index
    %c0_29 = arith.constant 0 : index
    %20 = vector.load %arg2[%c0_27, %c0_28, %c0_29] : memref<2x1x2xi32, #tpu.memory_space<vmem>>, vector<2x1x2xi32>
    %21 = vector.extract_strided_slice %20 {offsets = [0, 0, 0], sizes = [2, 1, 1], strides = [1, 1, 1]} : vector<2x1x2xi32> to vector<2x1x1xi32>
    %22 = vector.shape_cast %21 : vector<2x1x1xi32> to vector<2xi32>
    %23 = vector.shape_cast %22 : vector<2xi32> to vector<2x1x1xi32>
    %24 = vector.extract_strided_slice %20 {offsets = [0, 0, 1], sizes = [2, 1, 1], strides = [1, 1, 1]} : vector<2x1x2xi32> to vector<2x1x1xi32>
    %25 = vector.shape_cast %24 : vector<2x1x1xi32> to vector<2xi32>
    %26 = vector.shape_cast %25 : vector<2xi32> to vector<2x1x1xi32>
    %27 = tpu.iota {dimensions = array<i32: 1>} : vector<2x16x1xi32>
    %c14_i32 = arith.constant 14 : i32
    %28 = vector.broadcast %c14_i32 : i32 to vector<2x16x1xi32>
    %29 = arith.cmpi slt, %27, %28 : vector<2x16x1xi32>
    %cst_30 = arith.constant 1.000000e+02 : f32
    %30 = vector.broadcast %cst_30 : f32 to vector<2x16x128xf32>
    %31 = arith.subf %19, %30 : vector<2x16x128xf32>
    %cst_31 = arith.constant -1.000000e+30 : f32
    %32 = vector.shape_cast %29 : vector<2x16x1xi1> to vector<2x16x1xi1>
    %33 = vector.broadcast %32 : vector<2x16x1xi1> to vector<2x16x128xi1>
    %34 = vector.broadcast %cst_31 : f32 to vector<2x16x128xf32>
    %35 = arith.select %33, %31, %34 : vector<2x16x128xi1>, vector<2x16x128xf32>
    %36 = vector.broadcast %23 : vector<2x1x1xi32> to vector<2x16x1xi32>
    %37 = arith.cmpi sle, %27, %36 : vector<2x16x1xi32>
    %38 = vector.broadcast %23 : vector<2x1x1xi32> to vector<2x16x1xi32>
    %39 = arith.cmpi sgt, %27, %38 : vector<2x16x1xi32>
    %40 = vector.broadcast %26 : vector<2x1x1xi32> to vector<2x16x1xi32>
    %41 = arith.cmpi sle, %27, %40 : vector<2x16x1xi32>
    %42 = arith.andi %39, %41 : vector<2x16x1xi1>
    %43 = vector.broadcast %26 : vector<2x1x1xi32> to vector<2x16x1xi32>
    %44 = arith.cmpi sgt, %27, %43 : vector<2x16x1xi32>
    %c0_32 = arith.constant 0 : index
    %c0_33 = arith.constant 0 : index
    %45 = vector.load %arg4[%c0_32, %c0_33] : memref<1x128xf32, #tpu.memory_space<vmem>>, vector<1x128xf32>
    %46 = arith.andi %37, %29 : vector<2x16x1xi1>
    %47 = vector.shape_cast %46 : vector<2x16x1xi1> to vector<2x16x1xi1>
    %48 = vector.broadcast %47 : vector<2x16x1xi1> to vector<2x16x128xi1>
    %49 = arith.select %48, %19, %35 : vector<2x16x128xi1>, vector<2x16x128xf32>
    %cst_34 = arith.constant dense<0xFF800000> : vector<2x128xf32>
    %50 = vector.multi_reduction <maximumf>, %49, %cst_34 [1] : vector<2x16x128xf32> to vector<2x128xf32>
    %51 = vector.broadcast %45 : vector<1x128xf32> to vector<2x128xf32>
    %52 = arith.addf %50, %51 : vector<2x128xf32>
    %cst_35 = arith.constant 0.000000e+00 : f32
    %53 = vector.broadcast %cst_35 : f32 to vector<2x128xf32>
    %54 = arith.maximumf %52, %53 : vector<2x128xf32>
    %c0_36 = arith.constant 0 : index
    %c0_37 = arith.constant 0 : index
    %c0_38 = arith.constant 0 : index
    %55 = vector.load %arg5[%c0_36, %c0_37, %c0_38] : memref<2x1x384xf32, #tpu.memory_space<vmem>>, vector<2x1x128xf32>
    %56 = vector.shape_cast %55 : vector<2x1x128xf32> to vector<2x128xf32>
    %57 = vector.shape_cast %54 : vector<2x128xf32> to vector<2x1x128xf32>
    tpu.vector_store %arg5[%c0_36, %c0_37, %c0_38], %57 {strides = array<i32>} : memref<2x1x384xf32, #tpu.memory_space<vmem>>, vector<2x1x128xf32>,
    %58 = arith.andi %42, %29 : vector<2x16x1xi1>
    %59 = vector.shape_cast %58 : vector<2x16x1xi1> to vector<2x16x1xi1>
    %60 = vector.broadcast %59 : vector<2x16x1xi1> to vector<2x16x128xi1>
    %61 = arith.select %60, %19, %35 : vector<2x16x128xi1>, vector<2x16x128xf32>
    %cst_39 = arith.constant dense<0xFF800000> : vector<2x128xf32>
    %62 = vector.multi_reduction <maximumf>, %61, %cst_39 [1] : vector<2x16x128xf32> to vector<2x128xf32>
    %63 = vector.broadcast %45 : vector<1x128xf32> to vector<2x128xf32>
    %64 = arith.addf %62, %63 : vector<2x128xf32>
    %cst_40 = arith.constant 0.000000e+00 : f32
    %65 = vector.broadcast %cst_40 : f32 to vector<2x128xf32>
    %66 = arith.maximumf %64, %65 : vector<2x128xf32>
    %c0_41 = arith.constant 0 : index
    %c0_42 = arith.constant 0 : index
    %c128 = arith.constant 128 : index
    %67 = vector.load %arg5[%c0_41, %c0_42, %c128] : memref<2x1x384xf32, #tpu.memory_space<vmem>>, vector<2x1x128xf32>
    %68 = vector.shape_cast %67 : vector<2x1x128xf32> to vector<2x128xf32>
    %69 = vector.shape_cast %66 : vector<2x128xf32> to vector<2x1x128xf32>
    tpu.vector_store %arg5[%c0_41, %c0_42, %c128], %69 {strides = array<i32>} : memref<2x1x384xf32, #tpu.memory_space<vmem>>, vector<2x1x128xf32>,
    %70 = arith.andi %44, %29 : vector<2x16x1xi1>
    %71 = vector.shape_cast %70 : vector<2x16x1xi1> to vector<2x16x1xi1>
    %72 = vector.broadcast %71 : vector<2x16x1xi1> to vector<2x16x128xi1>
    %73 = arith.select %72, %19, %35 : vector<2x16x128xi1>, vector<2x16x128xf32>
    %cst_43 = arith.constant dense<0xFF800000> : vector<2x128xf32>
    %74 = vector.multi_reduction <maximumf>, %73, %cst_43 [1] : vector<2x16x128xf32> to vector<2x128xf32>
    %75 = vector.broadcast %45 : vector<1x128xf32> to vector<2x128xf32>
    %76 = arith.addf %74, %75 : vector<2x128xf32>
    %cst_44 = arith.constant 0.000000e+00 : f32
    %77 = vector.broadcast %cst_44 : f32 to vector<2x128xf32>
    %78 = arith.maximumf %76, %77 : vector<2x128xf32>
    %c0_45 = arith.constant 0 : index
    %c0_46 = arith.constant 0 : index
    %c256 = arith.constant 256 : index
    %79 = vector.load %arg5[%c0_45, %c0_46, %c256] : memref<2x1x384xf32, #tpu.memory_space<vmem>>, vector<2x1x128xf32>
    %80 = vector.shape_cast %79 : vector<2x1x128xf32> to vector<2x128xf32>
    %81 = vector.shape_cast %78 : vector<2x128xf32> to vector<2x1x128xf32>
    tpu.vector_store %arg5[%c0_45, %c0_46, %c256], %81 {strides = array<i32>} : memref<2x1x384xf32, #tpu.memory_space<vmem>>, vector<2x1x128xf32>,
    return
  }
  func.func @transform_0(%arg0: i32) -> (i32, i32, i32) {
    %c0_i32 = arith.constant 0 : i32
    %c0_i32_0 = arith.constant 0 : i32
    %c0_i32_1 = arith.constant 0 : i32
    return %arg0, %c0_i32, %c0_i32_0 : i32, i32, i32
  }
  func.func @transform_1(%arg0: i32) -> (i32, i32, i32) {
    %c0_i32 = arith.constant 0 : i32
    %c0_i32_0 = arith.constant 0 : i32
    %c0_i32_1 = arith.constant 0 : i32
    return %arg0, %c0_i32, %c0_i32_0 : i32, i32, i32
  }
  func.func @transform_2(%arg0: i32) -> (i32, i32) {
    %c0_i32 = arith.constant 0 : i32
    %c0_i32_0 = arith.constant 0 : i32
    %c0_i32_1 = arith.constant 0 : i32
    return %c0_i32, %c0_i32_0 : i32, i32
  }
  func.func @transform_3(%arg0: i32) -> (i32, i32) {
    %c0_i32 = arith.constant 0 : i32
    %c0_i32_0 = arith.constant 0 : i32
    %c0_i32_1 = arith.constant 0 : i32
    return %c0_i32, %c0_i32_0 : i32, i32
  }
  func.func @transform_4(%arg0: i32) -> (i32, i32, i32) {
    %c0_i32 = arith.constant 0 : i32
    %c0_i32_0 = arith.constant 0 : i32
    %c0_i32_1 = arith.constant 0 : i32
    return %arg0, %c0_i32, %c0_i32_0 : i32, i32, i32
  }
}

</mosaic_0001>

<bundles_post_ra>
// kernel: tpu_custom_call.1
= control target key start
LH: loop header
LB: loop body
LE: loop exit
PB: predicated region body
PF: predicated region fallthrough
CT: control target
= control target key end

     0   :  { %9 = vsyncpa [#allocation4], 0  ;;  %s1466_s0 = inlined_call_operand.hbm [shape: f32[3,14,16], index: 0, kind: input, shape index: {}]   ;;  %s1467_s1 = inlined_call_operand.vmem [shape: s32[3,1,2], index: 1, kind: input, shape index: {}]   ;;  %s1468_s2 = inlined_call_operand.hbm [shape: bf16[48,128], index: 2, kind: input, shape index: {}]   ;;  %s1469_s3 = inlined_call_operand.vmem [shape: f32[1,128], index: 3, kind: input, shape index: {}]   ;;  %s1470_s4 = inlined_call_operand.hbm [shape: f32[3,1,384], index: 4, kind: output, shape index: {}]  }
   0x1   :  { %11 = vsyncpa [#allocation4 + $0x1], 0 }
   0x2   :  { %12 = vsyncpa [#allocation7], 0 }
   0x3   :  { %13 = vsyncpa [#allocation5], 0 }
   0x4   :  { %15 = vsyncpa [#allocation5 + $0x1], 0  ;;  %s1081_s15 = smov 0   ;;  %s1083_s16 = smov 0  }
   0x5   :  { %s1085_s17 = smov 0   ;;  %s1087_s18 = smov 0  }
   0x6 LB: > { %s1102_s19 = sadd.s32 4294967295, %s1040_s18   ;;  %s783_s20 = sadd.s32 4294967294, %s1040_s18   ;;  %s1040_s18 = sphi %s1087_s18, %s1500_s18   ;;  %s1036_s17 = sphi %s1085_s17, %s1499_s17   ;;  %s1032_s16 = sphi %s1083_s16, %s1498_s16   ;;  %s1028_s15 = sphi %s1081_s15, %s1497_s15  }
   0x7   : > { %s1106_s21 = sadd.s32 1, %s1040_s18   ;;  %s28_s22 = sadd.s32 1, %s1036_s17 }
   0x8   : > { %s25_s23 = ssub.s32 %s1040_s18, %s1106_s21  ;;  %p35_p0 = scmp.ne.s32.totalorder %s1036_s17, %s1032_s16 }
   0x9   : > { %p26_p1 = scmp.eq.s32.totalorder %s25_s23, 0  ;;  %p36_p2 = scmp.eq.s32.totalorder %s1040_s18, 0 }
   0xa   : > { %p41_p3 = scmp.ne.s32.totalorder %s1032_s16, %s1028_s15  ;;  %p1471_p4 = scmp.eq.s32.totalorder %s1102_s19, 0 }
   0xb   : > { %s1118_s24 = scalar_select %p26_p1, %s1036_s17, %s28_s22  }
   0xc   : > { %p1120_p5 = por %p36_p2, %p35_p0  ;;  %p1126_p6 = por %p1471_p4, %p41_p3 }
   0xd   : > { %p133_p7 = scmp.eq.s32.totalorder %s1102_s19, 1  ;;  %p139_p8 = scmp.eq.s32.totalorder %s783_s20, 1 }
   0xe   : > { %s1474_s25 = scalar_select %p1120_p5, 1, 0 }
   0xf   : > { %s1475_s26 = scalar_select %p1126_p6, 1, 0 }
  0x10   : > { %p784_p9 = scmp.ge.s32.totalorder %s1040_s18, 1  ;;  %p146_p10 = scmp.lt.s32.totalorder %s1040_s18, 3 }
  0x11   : > { %p1133_p11 = por %p133_p7, %p35_p0  ;;  %p1137_p12 = por %p139_p8, %p41_p3 }
  0x12   : > { %p1141_p13 = pnand %p784_p9, %p146_p10  ;;  %s1042_s30 = smov [#allocation6]  }
  0x13   : > { %s1476_s27 = scalar_select %p1133_p11, 1, 0 }
  0x14   : > { %s1477_s28 = scalar_select %p1137_p12, 1, 0 }
  0x15   : > { %s1478_s29 = scalar_select %p1141_p13, 1, 0 }
  0x16   : > { %p850_p1 = pneg %p1141_p13  ;;  %s158_s5 = sshll.u32 %s1042_s30, 4  ;;  %s159_s5 = int_to_ptr.vmem [resolvable:$true] %s158_s5 }
  0x17   : > { %s914_s9 = scalar_lea.hbm %s1468_s2, 384 }
  0x18   : > { %p1149_p2 = pnand %p850_p1, %p1471_p4  ;;  %p915_p0 = scmp.ne.s32.totalorder %s1468_s2, %s914_s9 }
  0x19   : > { %p921_p9 = scmp.lt.u32.totalorder %s914_s9, %s1468_s2 }
  0x1a   : > { %p916_p3 = pneg %p1149_p2 }
  0x1c   : > { %p917_p7 = pnand %p916_p3, %p915_p0 }
  0x1e   : > { %p918_p8 = pneg %p917_p7 }
  0x20   : > { %p923_p10 = pnand %p921_p9, %p918_p8 }
  0x22   : > { %926 = shalt.err (!%p923_p10)
}
  0x23   : > { %s927_s14 = scalar_lea.vmem %s159_s5, 384  ;;  %p935_p11 = scmp.lt.s32.totalorder %s159_s5, %s159_s5 }
  0x24   : > { %p928_p1 = scmp.ne.s32.totalorder %s159_s5, %s927_s14  ;;  %p936_p6 = scmp.lt.s32.totalorder %s927_s14, %s927_s14 }
  0x26   : > { %p930_p4 = pnand %p928_p1, %p916_p3  ;;  %p937_p13 = por %p936_p6, %p935_p11 }
  0x28   : > { %p931_p12 = pneg %p930_p4 }
  0x2a   : > { %p938_p5 = pnand %p937_p13, %p931_p12 }
  0x2c   : > { %941 = shalt.err (!%p938_p5)
}
  0x2d   : > { %s1043_s20 = smov 64   ;;  %s1044_s22 = smov 4  }
  0x2e   : > { %853 = dma.hbm_to_vmem [thread:$0]  (!%p1149_p2), %s1468_s2, 384, %s159_s5, [#allocation7], %s1043_s20, %s1043_s20, %s1044_s22  }
  0x2f   : > { %p786_p0 = scmp.ge.s32.totalorder %s1040_s18, 2 }
  0x30   : > { %p1480_p4 = scmp.ne.s32.totalorder (!%p786_p0), %s1474_s25, 0 }
  0x31   : > { %171 = sbr.rel (%p786_p0) target bundleno = 91 (0x5b), region = 24 }
  0x38   : > { %174 = sbr.rel (!%p1480_p4) target bundleno = 91 (0x5b), region = 28  ;;  %s175_s7 = sand.u32 (%p1480_p4), 1, %s1036_s17  }
  0x39   : > { %s788_s8 = sshll.u32 (%p1480_p4), %s1040_s18, 1  ;;  %s787_s9 = sshll.u32 (%p1480_p4), %s175_s7, 5 }
  0x3a   : > { %s181_s10 = ssub.s32 (%p1480_p4), 3, %s788_s8  ;;  %s1179_s11 = scalar_lea.sflag (%p1480_p4), [#allocation4], %s175_s7 }
  0x3b   : > { %p182_p5 = scmp.lt.s32.totalorder (%p1480_p4), %s181_s10, 2  ;;  %s179_s12 = scalar_lea.vmem (%p1480_p4), [#allocation3], %s787_s9 }
  0x3f   : > { %s1502_s10 = smov (!%p182_p5, %s181_s10), 2 }
  0x40   : > { %s1176_s6 = sshll.u32 %s1502_s10, 8 }
  0x41   : > { %s187_s5 = ssub.s32 512, %s1176_s6 }
  0x42   : > { %188 = vsyncadd %s1179_s11, %s187_s5  ;;  %p791_p6 = scmp.ne.s32.totalorder %s1176_s6, 0  ;;  %s824_s25 = sshll.u32 %s1040_s18, 9 }
  0x43   : > { %s1187_s20 = scalar_lea.hbm %s1466_s0, %s824_s25  ;;  %s195_s22 = sshll.u32 %s179_s12, 4  ;;  %s1189_s22 = int_to_ptr.vmem [resolvable:$true] %s195_s22 }
  0x44   : > { %s942_s23 = scalar_lea.hbm %s1187_s20, %s1176_s6  ;;  %s946_s8 = scalar_lea.hbm %s1466_s0, 768 }
  0x45   : > { %p943_p11 = scmp.ne.s32.totalorder %s1187_s20, %s942_s23  ;;  %p947_p2 = scmp.lt.u32.totalorder %s1187_s20, %s1466_s0 }
  0x46   : > { %p948_p3 = scmp.lt.u32.totalorder %s946_s8, %s942_s23  ;;  %p950_p8 = scmp.lt.u32.totalorder %s942_s23, %s1187_s20 }
  0x47   : > { %p944_p12 = pnand %p943_p11, %p791_p6 }
  0x48   : > { %p949_p7 = por %p948_p3, %p947_p2 }
  0x49   : > { %p945_p13 = pneg %p944_p12 }
  0x4a   : > { %p951_p9 = por %p950_p8, %p949_p7 }
  0x4c   : > { %p952_p10 = pnand %p951_p9, %p945_p13 }
  0x4e   : > { %955 = shalt.err (!%p952_p10)
}
  0x4f   : > { %s956_s5 = scalar_lea.vmem %s1189_s22, %s1176_s6  ;;  %s1045_s12 = smov [#allocation3]  }
  0x50   : > { %p957_p1 = scmp.ne.s32.totalorder %s1189_s22, %s956_s5  ;;  %s960_s25 = sshll.u32 %s1045_s12, 4  ;;  %s961_s25 = int_to_ptr.vmem [resolvable:$false] %s960_s25 }
  0x51   : > { %s962_s13 = scalar_lea.vmem %s961_s25, 1024  ;;  %p963_p11 = scmp.lt.s32.totalorder %s1189_s22, %s961_s25 }
  0x52   : > { %p958_p4 = pnand %p957_p1, %p791_p6  ;;  %p964_p12 = scmp.lt.s32.totalorder %s962_s13, %s956_s5 }
  0x54   : > { %p959_p5 = pneg %p958_p4  ;;  %p965_p2 = por %p964_p12, %p963_p11 }
  0x56   : > { %p966_p3 = pnand %p965_p2, %p959_p5 }
  0x58   : > { %969 = shalt.err (!%p966_p3)
}
  0x59   : > { %s1046_s14 = smov 128   ;;  %s1047_s23 = smov 8  }
  0x5a   : > { %201 = dma.hbm_to_vmem [thread:$0]  (%p791_p6), %s1187_s20, %s1176_s6, %s1189_s22, %s1179_s11, %s1046_s14, %s1046_s14, %s1047_s23  }
  0x5b PF: > { %p1481_p13 = scmp.ne.s32.totalorder %s1478_s29, 0 }
  0x5c   : > { %s1219_s30 = sand.u32 (!%p1481_p13), 1, %s1032_s16   ;;  %p1482_p7 = scmp.ne.s32.totalorder (!%p1481_p13), %s1475_s26, 0 }
  0x5d   : > { %223 = sbr.rel (%p1481_p13) target bundleno = 525 (0x20d), region = 36  ;;  %s798_s7 = sshll.u32 (!%p1481_p13), %s1219_s30, 5 }
  0x5e   : > { %s226_s8 = scalar_lea.sflag (!%p1481_p13), [#allocation4], %s1219_s30  ;;  %s229_s9 = scalar_lea.vmem (!%p1481_p13), [#allocation3], %s798_s7 }
  0x64   : > { %1015 = dma.done.wait (%p1482_p7), %s226_s8, 512  }
  0x65   : > { %1017 = vsyncadd (%p1482_p7), %s226_s8, 4294966784  ;;  %p1483_p6 = scmp.eq.s32.totalorder %s1102_s19, 0 }
  0x67   : > { %1019 = dma.done.wait (%p1483_p6), [#allocation7], 384   ;;  %p1484_p8 = pmov %p1483_p6 }
  0x68   : > { %v461_v0 = vlaneseq  ;;  %s1232_s29 = sshll.u32 %s1102_s19, 1  ;;  %vm307_vm0 = vcmask 130055   ;;  %vm335_vm1 = vcmask 261255   ;;  %v1048_v1 = vmov 0   ;;  %v292_v4 = vld [vmem:[%s229_s9] sm:$0xff]  ;;  %v294_v6 = vld [vmem:[%s229_s9 + $0x10] sm:$0xff] }
  0x69   : > { %1021 = vsyncadd (%p1484_p8), [#allocation7], 4294966912  ;;  %p277_p9 = scmp.lt.s32.totalorder %s1232_s29, 2  ;;  %906 = vset.pattern.permute.xlu1 %v1048_v1  ;;  %905 = vset.pattern.permute.xlu0 %v1048_v1  ;;  %vm298_vm2 = vcmask 122880   ;;  %vm299_vm3 = vsmask.f32 256 }
  0x6a   : > { %v1238_v2 = vshrl.u32 %v461_v0, 7  ;;  %308 = vst.msk [vmem:[#allocation2] sm:$0x80] %vm307_vm0, %v1048_v1  ;;  %309 = vst.msk [vmem:[#allocation2 + $0x8] sm:$0x80] %vm307_vm0, %v1048_v1  ;;  %vm326_vm5 = vcmask 129024  }
  0x6b   : > { %s278_s26 = scalar_select %p277_p9, %s1232_s29, 2  ;;  %336 = vst.msk [vmem:[#allocation2] sm:$0x80] %vm335_vm1, %v1048_v1  ;;  %337 = vst.msk [vmem:[#allocation2 + $0x8] sm:$0x80] %vm335_vm1, %v1048_v1  ;;  %v911_v24 = vld [vmem:[#allocation6] sm:$0xff]  }
  0x6c   : > { %vm1245_vm4 = vmand %vm298_vm2, %vm299_vm3  ;;  %v293_v5 = vld [vmem:[%s229_s9 + $0x8] sm:$0x3f]  ;;  %v1255_v7 = vadd.s32 8, %v1238_v2  ;;  %v295_v9 = vld [vmem:[%s229_s9 + $0x18] sm:$0x3f]  ;;  %s1049_s22 = smov 16   ;;  %832 = vmatprep.subr.bf16.mxu0 %v911_v24 }
  0x6d   : > { %s1252_s20 = scalar_lea.vmem %s1467_s1, %s278_s26  ;;  %v296_v8 = vpack.c.bf16 %v293_v5, %v292_v4  ;;  %v301_v10 = vld [vmem:[#allocation2] sm:$0x1]  ;;  %v304_v11 = vld [vmem:[#allocation2 + $0x8] sm:$0x1]  ;;  %v297_v12 = vpack.c.bf16 %v295_v9, %v294_v6  ;;  %vm327_vm6 = vsmask.f32 7938  ;;  %833 = vmatpush3.bf16.msra.mxu0 %v911_v24 }
  0x6e   : > { %v302_v13 = vsel %vm1245_vm4, 0, %v301_v10  ;;  %v305_v14 = vsel %vm1245_vm4, 0, %v304_v11  ;;  %v1262_v15 = vld [vmem:[%s1252_s20] ss:$0 sm:$0xff]  ;;  %vm1267_vm8 = vmand %vm326_vm5, %vm327_vm6  ;;  %v1276_v30 = vld [vmem:[%s1252_s20 + $0x1] ss:$0 sm:$0xff] }
  0x6f   : > { %340 = vrot.lane.b32.xlu0 %v296_v8, %s1049_s22  ;;  %303 = vst [vmem:[#allocation2] sm:$0x1] %v302_v13  ;;  %v311_v16 = vshrl.u32 %v296_v8, 16  ;;  %v314_v17 = vshll.u32 %v296_v8, 16  ;;  %306 = vst [vmem:[#allocation2 + $0x8] sm:$0x1] %v305_v14  ;;  %vm487_vm7 = vcmp.le.s32.totalorder %v1255_v7, %v1262_v15  ;;  %vm486_vm9 = vcmp.le.s32.totalorder %v1238_v2, %v1262_v15 }
  0x70   : > { %v318_v18 = vshrl.u32 %v297_v12, 16  ;;  %v321_v19 = vshll.u32 %v297_v12, 16  ;;  %v495_v29 = vsel %vm487_vm7, 1, %v1048_v1  ;;  %s1050_s10 = smov 32   ;;  %v912_v34 = vld [vmem:[#allocation6 + $0x8] sm:$0xff]   ;;  %s1051_s5 = smov 127   ;;  %vm489_vm10 = vcmp.le.s32.totalorder %v1255_v7, %v1276_v30 }
  0x71   : > { %v358_v20 = vrot.slane %v314_v17, 1  ;;  %v313_v21 = vrot.slane %v311_v16, 7  ;;  %v494_v37 = vsel %vm486_vm9, 1, %v1048_v1  ;;  %834 = vmatprep.subr.bf16.mxu0 %v912_v34  ;;  %v913_v38 = vld [vmem:[#allocation6 + $0x10] sm:$0xff]   ;;  %v497_v39 = vsel %vm489_vm10, 1, %v1048_v1  ;;  %s842_s12 = smul.u32 6, %s1219_s30 }
  0x72   : > { %v320_v22 = vrot.slane %v318_v18, 7  ;;  %v360_v23 = vrot.slane %v321_v19, 1  ;;  %835 = vmatpush3.bf16.msra.mxu0 %v912_v34  ;;  %vm488_vm11 = vcmp.le.s32.totalorder %v1238_v2, %v1276_v30  ;;  %vm465_vm12 = vcmp.lt.s32.totalorder %v1255_v7, 14  ;;  %s670_s23 = scalar_lea.sflag [#allocation5], %s1219_s30  ;;  %p1495_p10 = scmp.ne.s32.totalorder %s1476_s27, 0 }
  0x73   : > { %342 = vrot.lane.b32.xlu0 %v297_v12, %s1049_s22  ;;  %v359_v25 = vor.u32 %v358_v20, %v311_v16  ;;  %v316_v26 = vor.u32 %v314_v17, %v313_v21  ;;  %836 = vmatprep.subr.bf16.mxu0 %v913_v38  ;;  %v496_v40 = vsel %vm488_vm11, 1, %v1048_v1  ;;  %vm491_vm13 = vcmp.gt.s32.totalorder %v1255_v7, %v1262_v15  ;;  %vm516_vm14 = vmand %vm487_vm7, %vm465_vm12  ;;  %s265_s14 = scalar_lea.vmem [#allocation8], %s842_s12  ;;  %s678_s7 = ssub.s32 (%p1495_p10), 3, %s1232_s29 }
  0x74   : > { %v323_v28 = vor.u32 %v321_v19, %v320_v22  ;;  %v361_v31 = vor.u32 %v360_v23, %v318_v18  ;;  %vm493_vm15 = vcmp.gt.s32.totalorder %v1255_v7, %v1276_v30  ;;  %vm492_vm0 = vcmp.gt.s32.totalorder %v1238_v2, %v1276_v30  ;;  %vm518_vm1 = vmand %vm489_vm10, %vm465_vm12  ;;  %p679_p1 = scmp.lt.s32.totalorder (%p1495_p10), %s678_s7, 2 }
  0x75   : > { %362 = vrot.lane.b32.xlu1 %v359_v25, %s1050_s10  ;;  %v520_v41 = vsel %vm516_vm14, 1, %v1048_v1  ;;  %v522_v42 = vsel %vm518_vm1, 1, %v1048_v1  ;;  %vm490_vm2 = vcmp.gt.s32.totalorder %v1238_v2, %v1262_v15  ;;  %v1052_v44 = vmov 1  }
  0x76   : > { %v329_v32 = vld [vmem:[#allocation2] sm:$0x7f]  ;;  %v332_v33 = vld [vmem:[#allocation2 + $0x8] sm:$0x7f]  ;;  %837 = vmatpush3.bf16.msra.mxu0 %v913_v38  ;;  %v625_v43 = vsel %vm490_vm2, 1, %v1048_v1  ;;  %vm346_vm3 = vcmask 260224  }
  0x77   : > { %v330_v35 = vsel %vm1267_vm8, %v316_v26, %v329_v32  ;;  %v333_v36 = vsel %vm1267_vm8, %v323_v28, %v332_v33  ;;  %500 = vrot.lane.b32.xlu0 %v495_v29, %s1051_s5  ;;  %vm349_vm4 = vcmask 392454   ;;  %vm350_vm5 = vsmask.f32 7962 }
  0x78   : > { %331 = vst [vmem:[#allocation2] sm:$0x7f] %v330_v35  ;;  %334 = vst [vmem:[#allocation2 + $0x8] sm:$0x7f] %v333_v36  ;;  %vm368_vm10 = vcmask 391424   ;;  %v627_v8 = vsel %vm492_vm0, 1, %v1048_v1 }
  0x79   : > { %364 = vrot.lane.b32.xlu1 %v361_v31, %s1050_s10  ;;  %vm1320_vm6 = vmand %vm349_vm4, %vm350_vm5  ;;  %vm369_vm11 = vsmask.f32 6400 }
  0x7b   : > { %498 = vrot.lane.b32.xlu0 %v494_v37, %s1051_s5 }
  0x7d   : > { %504 = vrot.lane.b32.xlu1 %v497_v39, %s1051_s5 }
  0x7f   : > { %524 = vperm.xlu0 %905, %v494_v37  }
  0x81   : > { %502 = vrot.lane.b32.xlu1 %v496_v40, %s1051_s5 }
  0x83   : > { %533 = vperm.xlu0 %905, %v522_v42  }
  0x85   : > { %527 = vperm.xlu1 %906, %v520_v41  }
  0x89   : > { %530 = vperm.xlu1 %906, %v496_v40  }
  0x8d   : > { %907 = vset.pattern.permute.xlu1 %v1052_v44 }
  0x8e   : > { %630 = vperm.xlu1 %907, %v625_v43  }
  0x92   : > { %908 = vset.pattern.permute.xlu1 %v1048_v1 }
  0xe1   : > { %v341_v45 = vpop.permute.xlu0 %340 }
  0xe2   : > { %347 = vst.msk [vmem:[#allocation2] sm:$0x7f] %vm346_vm3, %v341_v45 }
  0xe5   : > { %v343_v46 = vpop.permute.xlu0 %342 }
  0xe6   : > { %348 = vst.msk [vmem:[#allocation2 + $0x8] sm:$0x7f] %vm346_vm3, %v343_v46  ;;  %vm1337_vm3 = vmand %vm368_vm10, %vm369_vm11 }
  0xe7   : > { %v363_v48 = vpop.permute.xlu1 %362 }
  0xe9   : > { %v352_v49 = vld [vmem:[#allocation2] sm:$0xc0]  ;;  %v501_v50 = vpop.permute.xlu0 %500 }
  0xea   : > { %v353_v51 = vsel %vm1320_vm6, 0, %v352_v49  ;;  %vm507_vm7 = vcmp.ne.s32.totalorder %v501_v50, 0 }
  0xeb   : > { %354 = vst [vmem:[#allocation2] sm:$0xc0] %v353_v51  ;;  %v365_v52 = vpop.permute.xlu1 %364  ;;  %vm511_vm8 = vmand %vm491_vm13, %vm507_vm7 }
  0xec   : > { %vm574_vm9 = vmand %vm511_vm8, %vm465_vm12 }
  0xed   : > { %v355_v53 = vld [vmem:[#allocation2 + $0x8] sm:$0xc0]  ;;  %v578_v54 = vsel %vm574_vm9, 1, %v1048_v1  ;;  %v499_v55 = vpop.permute.xlu0 %498  ;;  %vm403_vm9 = vcmask 392192  }
  0xee   : > { %v356_v56 = vsel %vm1320_vm6, 0, %v355_v53  ;;  %585 = vperm.xlu0 %905, %v578_v54   ;;  %vm506_vm14 = vcmp.ne.s32.totalorder %v499_v55, 0 }
  0xef   : > { %357 = vst [vmem:[#allocation2 + $0x8] sm:$0xc0] %v356_v56  ;;  %v505_v57 = vpop.permute.xlu1 %504  ;;  %vm510_vm1 = vmand %vm490_vm2, %vm506_vm14 }
  0xf0   : > { %vm509_vm4 = vcmp.ne.s32.totalorder %v505_v57, 0  ;;  %v577_v59 = vsel %vm510_vm1, 1, %v1048_v1  ;;  %vm622_vm2 = vmand %vm491_vm13, %vm465_vm12 }
  0xf1   : > { %vm513_vm5 = vmand %vm493_vm15, %vm509_vm4  ;;  %582 = vperm.xlu1 %908, %v577_v59   ;;  %v626_v5 = vsel %vm622_vm2, 1, %v1048_v1 }
  0xf2   : > { %v371_v60 = vld [vmem:[#allocation2] sm:$0x7f]  ;;  %vm576_vm6 = vmand %vm513_vm5, %vm465_vm12 }
  0xf3   : > { %v372_v61 = vsel %vm1337_vm3, %v363_v48, %v371_v60  ;;  %v580_v62 = vsel %vm576_vm6, 1, %v1048_v1  ;;  %v503_v63 = vpop.permute.xlu1 %502  ;;  %vm624_vm13 = vmand %vm493_vm15, %vm465_vm12 }
  0xf4   : > { %373 = vst [vmem:[#allocation2] sm:$0x7f] %v372_v61  ;;  %591 = vperm.xlu0 %905, %v580_v62   ;;  %vm508_vm7 = vcmp.ne.s32.totalorder %v503_v63, 0  ;;  %v628_v10 = vsel %vm624_vm13, 1, %v1048_v1 }
  0xf5   : > { %vm512_vm8 = vmand %vm492_vm0, %vm508_vm7 }
  0xf6   : > { %v374_v3 = vld [vmem:[#allocation2 + $0x8] sm:$0x7f]  ;;  %v579_v4 = vsel %vm512_vm8, 1, %v1048_v1 }
  0xf7   : > { %v375_v6 = vsel %vm1337_vm3, %v365_v52, %v374_v3  ;;  %588 = vperm.xlu1 %908, %v579_v4  }
  0xf8   : > { %376 = vst [vmem:[#allocation2 + $0x8] sm:$0x7f] %v375_v6  ;;  %909 = vset.pattern.permute.xlu0 %v1052_v44 }
  0xf9   : > { %633 = vperm.xlu0 %909, %v626_v5  }
  0xfb   : > { %v377_v9 = vld [vmem:[#allocation2] sm:$0xff]  ;;  %910 = vset.pattern.permute.xlu1 %v1052_v44 }
  0xfc   : > { %838 = vmatprep.mubr.msk.bf16.mxu0 %vm403_vm9, %v377_v9  ;;  %636 = vperm.xlu1 %910, %v627_v8  }
  0xfe   : > { %v525_v14 = vpop.permute.xlu0 %524 }
  0xff   : > { %v378_v11 = vld [vmem:[#allocation2 + $0x8] sm:$0xff]  ;;  %vm535_vm15 = vcmp.eq.s32.totalorder %v525_v14, 1  ;;  %v812_v14 = vld [vmem:[%s1469_s3] ss:$0 sm:$0xff] }
 0x100   : > { %839 = vmatmul.mubr.msk.bf16.vlgmr.msra.gmra.mrb[0].mxu0 %vm403_vm9, %v378_v11  ;;  %639 = vperm.xlu1 %910, %v628_v10  }
 0x102   : > { %v534_v16 = vpop.permute.xlu0 %533 }
 0x103   : > { %vm538_vm0 = vcmp.eq.s32.totalorder %v534_v16, 1 }
 0x104   : > { %v528_v12 = vpop.permute.xlu1 %527 }
 0x105   : > { %vm536_vm10 = vcmp.eq.s32.totalorder %v528_v12, 1 }
 0x108   : > { %v531_v13 = vpop.permute.xlu1 %530 }
 0x109   : > { %vm537_vm11 = vcmp.eq.s32.totalorder %v531_v13, 1 }
 0x10d   : > { %v631_v2 = vpop.permute.xlu1 %630 }
 0x10e   : > { %vm641_vm14 = vcmp.eq.s32.totalorder %v631_v2, 1 }
 0x16d   : > { %v586_v18 = vpop.permute.xlu0 %585 }
 0x16e   : > { %vm594_vm1 = vcmp.eq.s32.totalorder %v586_v18, 1 }
 0x170   : > { %v583_v15 = vpop.permute.xlu1 %582 }
 0x171   : > { %vm593_vm3 = vcmp.eq.s32.totalorder %v583_v15, 1 }
 0x173   : > { %v592_v20 = vpop.permute.xlu0 %591 }
 0x174   : > { %vm596_vm5 = vcmp.eq.s32.totalorder %v592_v20, 1 }
 0x176   : > { %v589_v17 = vpop.permute.xlu1 %588 }
 0x177   : > { %vm595_vm6 = vcmp.eq.s32.totalorder %v589_v17, 1 }
 0x178   : > { %v634_v22 = vpop.permute.xlu0 %633 }
 0x179   : > { %vm642_vm2 = vcmp.eq.s32.totalorder %v634_v22, 1 }
 0x17b   : > { %v637_v19 = vpop.permute.xlu1 %636 }
 0x17c   : > { %vm643_vm4 = vcmp.eq.s32.totalorder %v637_v19, 1 }
 0x17f   : > { %v640_v23 = vpop.permute.xlu1 %639 }
 0x180   : > { %vm644_vm7 = vcmp.eq.s32.totalorder %v640_v23, 1 }
 0x1d3   : > { %v840_v21 = vpop.f32.mrb[0].mxu0 }
 0x1d4   : > { %v808_v1 = vadd.f32 -100.0, %v840_v21  ;;  %v444_v24 = vpop.f32.mrb[1].mxu0 }
 0x1d5   : > { %v806_v25 = vadd.f32 -100.0, %v444_v24  ;;  %v841_v26 = vpop.f32.mrb[2].mxu0 }
 0x1d6   : > { %v809_v27 = vadd.f32 -100.0, %v841_v26  ;;  %v447_v28 = vpop.f32.mrb[3].mxu0  ;;  %v541_v29 = vsel %vm537_vm11, %v840_v21, %v808_v1  ;;  %v599_v30 = vsel %vm595_vm6, %v840_v21, %v808_v1  ;;  %v647_v32 = vsel %vm643_vm4, %v840_v21, %v808_v1 }
 0x1d7   : > { %v807_v31 = vadd.f32 -100.0, %v447_v28  ;;  %v539_v34 = vsel %vm535_vm15, %v444_v24, %v806_v25  ;;  %v597_v35 = vsel %vm593_vm3, %v444_v24, %v806_v25  ;;  %v645_v46 = vsel %vm641_vm14, %v444_v24, %v806_v25 }
 0x1d8   : > { %v477_v33 = vsel %vm465_vm12, %v809_v27, -1e+30 }
 0x1d9   : > { %v542_v36 = vsel %vm538_vm0, %v841_v26, %v477_v33  ;;  %v600_v37 = vsel %vm596_vm5, %v841_v26, %v477_v33  ;;  %v648_v38 = vsel %vm644_vm7, %v841_v26, %v477_v33  ;;  %v475_v39 = vsel %vm465_vm12, %v807_v31, -1e+30 }
 0x1da   : > { %v550_v40 = vmax.f32 %v541_v29, %v542_v36  ;;  %v608_v41 = vmax.f32 %v599_v30, %v600_v37  ;;  %v656_v42 = vmax.f32 %v647_v32, %v648_v38  ;;  %v540_v43 = vsel %vm536_vm10, %v447_v28, %v475_v39 }
 0x1db   : > { %v543_v44 = vmax.f32 %v539_v34, %v540_v43  ;;  %v598_v45 = vsel %vm594_vm1, %v447_v28, %v475_v39  ;;  %v646_v47 = vsel %vm642_vm2, %v447_v28, %v475_v39  ;;  %vm1388_vm12 = vcmp.lt.s32.totalorder %v461_v0, 128 }
 0x1dc   : > { %v551_v48 = vrot.slane %v550_v40, 4  ;;  %v609_v49 = vrot.slane %v608_v41, 4  ;;  %v657_v50 = vrot.slane %v656_v42, 4  ;;  %v601_v51 = vmax.f32 %v597_v35, %v598_v45 }
 0x1dd   : > { %v544_v52 = vrot.slane %v543_v44, 4  ;;  %v649_v53 = vmax.f32 %v645_v46, %v646_v47 }
 0x1de   : > { %v552_v7 = vmax.f32 %v550_v40, %v551_v48  ;;  %v610_v54 = vmax.f32 %v608_v41, %v609_v49  ;;  %v658_v55 = vmax.f32 %v656_v42, %v657_v50  ;;  %v602_v56 = vrot.slane %v601_v51, 4 }
 0x1df   : > { %v545_v57 = vmax.f32 %v543_v44, %v544_v52  ;;  %v650_v58 = vrot.slane %v649_v53, 4 }
 0x1e0   : > { %v553_v59 = vrot.slane %v552_v7, 2  ;;  %v611_v60 = vrot.slane %v610_v54, 2  ;;  %v659_v61 = vrot.slane %v658_v55, 2  ;;  %v603_v62 = vmax.f32 %v601_v51, %v602_v56 }
 0x1e1   : > { %v546_v63 = vrot.slane %v545_v57, 2  ;;  %v651_v3 = vmax.f32 %v649_v53, %v650_v58 }
 0x1e2   : > { %v554_v4 = vmax.f32 %v552_v7, %v553_v59  ;;  %v612_v5 = vmax.f32 %v610_v54, %v611_v60  ;;  %v660_v6 = vmax.f32 %v658_v55, %v659_v61  ;;  %v604_v8 = vrot.slane %v603_v62, 2 }
 0x1e3   : > { %v547_v9 = vmax.f32 %v545_v57, %v546_v63  ;;  %v652_v10 = vrot.slane %v651_v3, 2 }
 0x1e4   : > { %v555_v11 = vrot.slane %v554_v4, 1  ;;  %v613_v12 = vrot.slane %v612_v5, 1  ;;  %v661_v13 = vrot.slane %v660_v6, 1  ;;  %v605_v2 = vmax.f32 %v603_v62, %v604_v8 }
 0x1e5   : > { %v548_v15 = vrot.slane %v547_v9, 1  ;;  %v653_v16 = vmax.f32 %v651_v3, %v652_v10 }
 0x1e6   : > { %v556_v17 = vmax.f32 %v554_v4, %v555_v11  ;;  %v614_v18 = vmax.f32 %v612_v5, %v613_v12  ;;  %v662_v19 = vmax.f32 %v660_v6, %v661_v13  ;;  %v606_v20 = vrot.slane %v605_v2, 1 }
 0x1e7   : > { %v549_v21 = vmax.f32 %v547_v9, %v548_v15  ;;  %v654_v22 = vrot.slane %v653_v16, 1 }
 0x1e8   : > { %v564_v1 = vadd.f32 %v812_v14, %v556_v17  ;;  %v616_v23 = vadd.f32 %v812_v14, %v614_v18  ;;  %v664_v24 = vadd.f32 %v812_v14, %v662_v19  ;;  %v607_v25 = vmax.f32 %v605_v2, %v606_v20 }
 0x1e9   : > { %v563_v27 = vadd.f32 %v812_v14, %v549_v21  ;;  %v655_v28 = vmax.f32 %v653_v16, %v654_v22  ;;  %676 = sbr.rel (!%p1495_p10) target bundleno = 525 (0x20d), region = 48 }
 0x1ea   : > { %v566_v29 = vmax.f32 %v564_v1, 0.0  ;;  %v618_v30 = vmax.f32 %v616_v23, 0.0  ;;  %v666_v31 = vmax.f32 %v664_v24, 0.0  ;;  %v615_v32 = vadd.f32 %v812_v14, %v607_v25 }
 0x1eb   : > { %v565_v33 = vmax.f32 %v563_v27, 0.0  ;;  %v663_v34 = vadd.f32 %v812_v14, %v655_v28 }
 0x1ec   : > { %572 = vst.msk [vmem:[%s265_s14 + $0x3] sm:$0x1] %vm1388_vm12, %v566_v29  ;;  %620 = vst.msk [vmem:[%s265_s14 + $0x4] sm:$0x1] %vm1388_vm12, %v618_v30  ;;  %v617_v0 = vmax.f32 %v615_v32, 0.0 }
 0x1ed   : > { %668 = vst.msk [vmem:[%s265_s14 + $0x5] sm:$0x1] %vm1388_vm12, %v666_v31  ;;  %571 = vst.msk [vmem:[%s265_s14] sm:$0x1] %vm1388_vm12, %v565_v33  ;;  %v665_v35 = vmax.f32 %v663_v34, 0.0 }
 0x1ee   : > { %619 = vst.msk [vmem:[%s265_s14 + $0x1] sm:$0x1] %vm1388_vm12, %v617_v0 }
 0x1ef   : > { %667 = vst.msk [vmem:[%s265_s14 + $0x2] sm:$0x1] %vm1388_vm12, %v665_v35 }
 0x1f0   : > { %s1504_s7 = smov (!%p679_p1, %s678_s7), 2 }
 0x1f1   : > { %s1408_s8 = smul.u32 48, %s1504_s7 }
 0x1f3   : > { %s684_s9 = ssub.s32 96, %s1408_s8 }
 0x1f4   : > { %685 = vsyncadd %s670_s23, %s684_s9  ;;  %p816_p4 = scmp.ne.s32.totalorder %s1408_s8, 0  ;;  %s843_s26 = smul.u32 96, %s1102_s19 }
 0x1f5   : > { %s691_s6 = sshll.u32 %s265_s14, 4  ;;  %s1053_s22 = smov [#allocation8]   ;;  %s1420_s6 = int_to_ptr.vmem [resolvable:$true] %s691_s6 }
 0x1f6   : > { %s1418_s20 = scalar_lea.hbm %s1470_s4, %s843_s26  ;;  %s970_s29 = scalar_lea.vmem %s1420_s6, %s1408_s8 }
 0x1f7   : > { %p971_p5 = scmp.ne.s32.totalorder %s1420_s6, %s970_s29  ;;  %s974_s10 = sshll.u32 %s1053_s22, 4  ;;  %s975_s10 = int_to_ptr.vmem [resolvable:$false] %s974_s10 }
 0x1f8   : > { %s976_s19 = scalar_lea.vmem %s975_s10, 192  ;;  %p977_p2 = scmp.lt.s32.totalorder %s1420_s6, %s975_s10 }
 0x1f9   : > { %p972_p11 = pnand %p971_p5, %p816_p4  ;;  %p978_p3 = scmp.lt.s32.totalorder %s976_s19, %s970_s29 }
 0x1fb   : > { %p973_p12 = pneg %p972_p11  ;;  %p979_p13 = por %p978_p3, %p977_p2 }
 0x1fd   : > { %p980_p7 = pnand %p979_p13, %p973_p12 }
 0x1ff   : > { %983 = shalt.err (!%p980_p7)
}
 0x200   : > { %s984_s5 = scalar_lea.hbm %s1418_s20, %s1408_s8  ;;  %s988_s13 = scalar_lea.hbm %s1470_s4, 144 }
 0x201   : > { %p985_p6 = scmp.ne.s32.totalorder %s1418_s20, %s984_s5  ;;  %p989_p10 = scmp.lt.u32.totalorder %s1418_s20, %s1470_s4 }
 0x202   : > { %p990_p1 = scmp.lt.u32.totalorder %s988_s13, %s984_s5  ;;  %p992_p11 = scmp.lt.u32.totalorder %s984_s5, %s1418_s20 }
 0x203   : > { %p986_p8 = pnand %p985_p6, %p816_p4 }
 0x204   : > { %p991_p5 = por %p990_p1, %p989_p10 }
 0x205   : > { %p987_p9 = pneg %p986_p8 }
 0x206   : > { %p993_p12 = por %p992_p11, %p991_p5 }
 0x208   : > { %p994_p2 = pnand %p993_p12, %p987_p9 }
 0x20a   : > { %997 = shalt.err (!%p994_p2)
}
 0x20b   : > { %s1054_s9 = smov 48   ;;  %s1055_s26 = smov 3  }
 0x20c   : > { %697 = dma.vmem_to_hbm [thread:$0]  (%p816_p4), %s1420_s6, %s1408_s8, %s1418_s20, %s670_s23, %s1054_s9, %s1054_s9, %s1055_s26  }
 0x20d PF: > { %s706_s27 = sand.u32 1, %s1028_s15   ;;  %p1496_p3 = scmp.ne.s32.totalorder %s1477_s28, 0 }
 0x20e   : > { %s707_s11 = scalar_lea.sflag [#allocation5], %s706_s27 }
 0x20f   : > { %p855_p13 = pnand %p786_p0, %p1496_p3 }
 0x211   : > { %1023 = dma.done.wait (!%p855_p13), %s707_s11, 96  }
 0x212   : > { %1025 = vsyncadd (!%p855_p13), %s707_s11, 4294967200  ;;  %p18_p7 = scmp.ge.s32.totalorder %s1106_s21, 4   ;;  %s1497_s15 = smov %s1032_s16 }
 0x213   : > { %s1498_s16 = smov %s1036_s17  ;;  %s1499_s17 = smov %s1118_s24 }
 0x214   : > { %s1500_s18 = smov %s1106_s21  ;;  %20 = sbr.rel (!%p18_p7) target bundleno = 6 (0x6), region = 88 }
 0x21b   :  { %712 = vsyncpa [#allocation4], 1 }
 0x21c   :  { %714 = vsyncpa [#allocation4 + $0x1], 1 }
 0x21d   :  { %715 = vsyncpa [#allocation7], 1 }
 0x21e   :  { %716 = vsyncpa [#allocation5], 1 }
 0x21f   :  { %718 = vsyncpa [#allocation5 + $0x1], 1 }

</bundles_post_ra>
